<compile_context>
chip_gen: v5e
topology: v5e:2x2
jax: 0.10.0
libtpu: 0.0.40
codegen_flags: <defaults>
</compile_context>

<pallas_src>
import functools

import jax
import jax.numpy as jnp
from jax.experimental import pallas as pl
from jax.experimental.pallas import tpu as pltpu

_LANE = 128


def _gdice_kernel(gt_ref, x_ref, p_out, y_out, py_out, *,
                  num_classes, tm_tile, tiles_per_split, t_mask_start,
                  needs_mask, valid_limit, dense_gt):
    j = pl.program_id(1)          # spatial split (parallel, megacore)
    k = pl.program_id(2)          # tile within the split (reduction axis)

    @pl.when(k == 0)
    def _():
        p_out[...] = jnp.zeros_like(p_out)
        y_out[...] = jnp.zeros_like(y_out)
        py_out[...] = jnp.zeros_like(py_out)

    x = x_ref[...].astype(jnp.float32)            # (C, TM, 128) logits

    def accumulate(valid):
        # mask BEFORE exp so OOB garbage can't produce inf/NaN
        xx = x if valid is None else jnp.where(valid[None], x, 0.0)
        # softmax over channel axis (leading, untiled -> elementwise over C
        # vreg slabs; exp on EUP, exact reciprocal for parity with softmax)
        m = jnp.max(xx, axis=0, keepdims=True)
        e = jnp.exp(xx - m)
        p = e * pl.reciprocal(jnp.sum(e, axis=0, keepdims=True), approx=False)

        if dense_gt:
            y = gt_ref[...].astype(jnp.float32)   # (C, TM, 128), may be soft
            if valid is not None:
                y = jnp.where(valid[None], y, 0.0)
                p_src = jnp.where(valid[None], p, 0.0)
            else:
                p_src = p
            p_out[...] += jnp.sum(p_src, axis=1)
            y_out[...] += jnp.sum(y, axis=1)
            py_out[...] += jnp.sum(p * y, axis=1)
        else:
            labels = gt_ref[...]                  # (TM, 128) int32 class ids
            cls = jax.lax.broadcasted_iota(
                jnp.int32, (num_classes,) + labels.shape, 0)
            eq = labels[None, :, :] == cls        # (C, TM, 128) bool
            if valid is not None:
                eq = jnp.logical_and(eq, valid[None])
                p_src = jnp.where(valid[None], p, 0.0)
            else:
                p_src = p
            p_out[...] += jnp.sum(p_src, axis=1)
            y_out[...] += jnp.sum(eq.astype(jnp.float32), axis=1)
            py_out[...] += jnp.sum(jnp.where(eq, p, 0.0), axis=1)

    if needs_mask:
        t = j * tiles_per_split + k               # global spatial tile index

        @pl.when(t < t_mask_start)                # full tiles: no mask ops
        def _():
            accumulate(None)

        @pl.when(t >= t_mask_start)               # ragged / fully-OOB tiles
        def _():
            rows = jax.lax.broadcasted_iota(jnp.int32, (tm_tile, _LANE), 0)
            lanes = jax.lax.broadcasted_iota(jnp.int32, (tm_tile, _LANE), 1)
            flat = (t * tm_tile + rows) * _LANE + lanes
            accumulate(flat < valid_limit)
    else:
        accumulate(None)


def gdice_loss(net_output, gt, smooth=1e-5, tm_tile=None):
    """Generalized Dice loss (forward).

    net_output: (B, C, H, W) logits (any float dtype; cast to f32 in-kernel).
    gt: (B, C, H, W) one-hot / soft targets (used as-is, like the reference),
        or (B, H, W) / (B, 1, H, W) integer class ids (one-hot built in-kernel).
    """
    B, C, H, W = net_output.shape
    S = H * W
    x = net_output.reshape(B, C, S)

    dense_gt = tuple(gt.shape) == tuple(net_output.shape)
    if dense_gt:
        y = gt.reshape(B, C, S)
    else:
        labels = gt.reshape(B, S).astype(jnp.int32)

    tm_total = pl.cdiv(S, _LANE)
    s128 = tm_total * _LANE
    if s128 != S:
        # TODO(synk): S % 128 != 0 still needs one minimal pad pass so the lane
        # reshape is layout-free; the pad region itself is masked in-kernel.
        x = jnp.pad(x, ((0, 0), (0, 0), (0, s128 - S)))
        if dense_gt:
            y = jnp.pad(y, ((0, 0), (0, 0), (0, s128 - S)))
        else:
            labels = jnp.pad(labels, ((0, 0), (0, s128 - S)), constant_values=C)
    x = x.reshape(B, C, tm_total, _LANE)
    gt_arr = (y.reshape(B, C, tm_total, _LANE) if dense_gt
              else labels.reshape(B, tm_total, _LANE))

    # ---- generation-aware spatial tile budget ----
    try:
        vmem_cap = int(pltpu.get_tpu_info().vmem_capacity_bytes)
    except Exception:
        vmem_cap = 64 * 1024 * 1024        # conservative fallback (v7x per-TC)
    x_bytes = jnp.dtype(x.dtype).itemsize
    gt_bytes = jnp.dtype(gt_arr.dtype).itemsize
    per_row = C * _LANE * x_bytes + (C * _LANE * gt_bytes if dense_gt
                                     else _LANE * 4)
    target_block = 4 << 20                 # ~4 MiB streamed block (HBM roofline)
    budget = (vmem_cap * 3) // 10          # double-buffered working-set budget
    if tm_tile is None:
        tm_tile = min(max(8, target_block // per_row),
                      max(8, budget // (2 * per_row)))
    tm_tile = int(min(tm_tile, tm_total))
    if tm_tile < tm_total:
        tm_tile = max(8, (tm_tile // 8) * 8)   # (8, 128) block alignment
        tm_tile = min(tm_tile, tm_total)
    num_tiles = pl.cdiv(tm_total, tm_tile)

    # Megacore: spatially split the reduction when B alone can't fill both TCs.
    n_split = 2 if (B % 2 == 1 and num_tiles >= 2) else 1
    tiles_per_split = pl.cdiv(num_tiles, n_split)

    covered = n_split * tiles_per_split * tm_tile * _LANE
    needs_mask = covered > S
    t_mask_start = S // (tm_tile * _LANE)

    def data_map(b, j, k):
        t = jnp.minimum(j * tiles_per_split + k, num_tiles - 1)
        return (b, 0, t, 0)

    def label_map(b, j, k):
        t = jnp.minimum(j * tiles_per_split + k, num_tiles - 1)
        return (b, t, 0)

    gt_spec = (pl.BlockSpec((None, C, tm_tile, _LANE), data_map) if dense_gt
               else pl.BlockSpec((None, tm_tile, _LANE), label_map))
    x_spec = pl.BlockSpec((None, C, tm_tile, _LANE), data_map)
    out_spec = pl.BlockSpec((None, None, C, _LANE), lambda b, j, k: (b, j, 0, 0))
    out_sds = jax.ShapeDtypeStruct((B, n_split, C, _LANE), jnp.float32)

    needed = 2 * tm_tile * per_row + 6 * C * _LANE * 4
    vmem_limit = int(min((vmem_cap * 4) // 5, max(32 << 20, needed + (8 << 20))))

    n_px = B * C * tm_total * _LANE
    cost = pl.CostEstimate(
        flops=10 * n_px,
        transcendentals=n_px,
        bytes_accessed=int(x.size) * x_bytes + int(gt_arr.size) * gt_bytes
        + 3 * B * n_split * C * _LANE * 4,
    )

    kernel = functools.partial(
        _gdice_kernel, num_classes=C, tm_tile=tm_tile,
        tiles_per_split=tiles_per_split, t_mask_start=t_mask_start,
        needs_mask=needs_mask, valid_limit=S, dense_gt=dense_gt)

    sum_p, sum_y, sum_py = pl.pallas_call(
        kernel,
        out_shape=(out_sds, out_sds, out_sds),
        grid_spec=pltpu.PrefetchScalarGridSpec(
            num_scalar_prefetch=0,
            grid=(B, n_split, tiles_per_split),
            in_specs=[gt_spec, x_spec],
            out_specs=(out_spec, out_spec, out_spec),
        ),
        compiler_params=pltpu.CompilerParams(
            dimension_semantics=("parallel", "parallel", "arbitrary"),
            vmem_limit_bytes=vmem_limit,
        ),
        cost_estimate=cost,
    )(gt_arr, x)

    # Tiny GDice finalize in JAX (keeps the grid fully parallel/arbitrary).
    sum_p = jnp.sum(sum_p, axis=(1, 3))    # (B, C)
    sum_y = jnp.sum(sum_y, axis=(1, 3))
    sum_py = jnp.sum(sum_py, axis=(1, 3))
    w = 1.0 / (sum_y + 1e-10) ** 2
    intersection = jnp.sum(w * sum_py, axis=1)
    union = jnp.sum(w * (sum_p + sum_y), axis=1)
    divided = -2.0 * (intersection + smooth) / (union + smooth)
    return jnp.mean(divided)


def _reference_loss(net_output, y_onehot, smooth=1e-5):
    p = jax.nn.softmax(net_output.astype(jnp.float32), axis=1)
    y = y_onehot.astype(jnp.float32)
    sum_y = jnp.einsum('bcxy->bc', y)
    w = 1.0 / (sum_y + 1e-10) ** 2
    inter = w * jnp.einsum('bcxy,bcxy->bc', p, y)
    union = w * (jnp.einsum('bcxy->bc', p) + sum_y)
    divided = -2.0 * (inter.sum(-1) + smooth) / (union.sum(-1) + smooth)
    return divided.mean()


if __name__ == "__main__":
    key = jax.random.PRNGKey(0)

    # Case 1: lane-aligned spatial (S=256), even batch -> fast (unmasked) path.
    k1, k2 = jax.random.split(key)
    B, C, H, W = 2, 4, 16, 16
    logits = jax.random.normal(k1, (B, C, H, W), jnp.float32)
    labels = jax.random.randint(k2, (B, H, W), 0, C)
    onehot = jax.nn.one_hot(labels, C, axis=1, dtype=jnp.float32)
    ref = _reference_loss(logits, onehot)
    out_dense = gdice_loss(logits, onehot)     # dense-gt path (no argmax)
    out_label = gdice_loss(logits, labels)     # integer-label path
    jax.block_until_ready((out_dense, out_label))
    assert jnp.allclose(out_dense, ref, rtol=2e-4, atol=1e-5), (out_dense, ref)
    assert jnp.allclose(out_label, ref, rtol=2e-4, atol=1e-5), (out_label, ref)

    # Case 2: multi-tile + ragged last tile + odd batch (spatial megacore split).
    k3, k4 = jax.random.split(k1)
    B, C, H, W = 1, 3, 48, 48
    logits = jax.random.normal(k3, (B, C, H, W), jnp.float32)
    labels = jax.random.randint(k4, (B, H, W), 0, C)
    onehot = jax.nn.one_hot(labels, C, axis=1, dtype=jnp.float32)
    ref = _reference_loss(logits, onehot)
    out_dense = gdice_loss(logits, onehot, tm_tile=8)
    out_label = gdice_loss(logits, labels, tm_tile=8)
    jax.block_until_ready((out_dense, out_label))
    assert jnp.allclose(out_dense, ref, rtol=2e-4, atol=1e-5), (out_dense, ref)
    assert jnp.allclose(out_label, ref, rtol=2e-4, atol=1e-5), (out_label, ref)

    # Case 3: S not a multiple of 128 (minimal 128-pad + in-kernel mask).
    k5, k6 = jax.random.split(k3)
    B, C, H, W = 2, 5, 10, 10
    logits = jax.random.normal(k5, (B, C, H, W), jnp.float32)
    labels = jax.random.randint(k6, (B, H, W), 0, C)
    onehot = jax.nn.one_hot(labels, C, axis=1, dtype=jnp.float32)
    ref = _reference_loss(logits, onehot)
    out_label = gdice_loss(logits, labels)
    jax.block_until_ready(out_label)
    assert jnp.allclose(out_label, ref, rtol=2e-4, atol=1e-5), (out_label, ref)

    print("KERNEL_OK")
</pallas_src>

<mosaic_0001>
module attributes {stable_mosaic.version = 11 : i64} {
  func.func @_gdice_kernel(%arg0: i32, %arg1: i32, %arg2: i32, %arg3: memref<1x4x2x128xf32, #tpu.memory_space<vmem>>, %arg4: memref<1x4x2x128xf32, #tpu.memory_space<vmem>>, %arg5: memref<1x1x4x128xf32, #tpu.memory_space<vmem>>, %arg6: memref<1x1x4x128xf32, #tpu.memory_space<vmem>>, %arg7: memref<1x1x4x128xf32, #tpu.memory_space<vmem>>) attributes {dimension_semantics = [#tpu.dimension_semantics<parallel>, #tpu.dimension_semantics<parallel>, #tpu.dimension_semantics<arbitrary>], iteration_bounds = array<i64: 2, 1, 1>, scalar_prefetch = 0 : i64, scratch_operands = 0 : i64, tpu.core_type = #tpu.core_type<tc>, window_params = [{transform_indices = @transform_0, window_bounds = array<i64: 1, 4, 2, 128>}, {transform_indices = @transform_1, window_bounds = array<i64: 1, 4, 2, 128>}, {transform_indices = @transform_2, window_bounds = array<i64: 1, 1, 4, 128>}, {transform_indices = @transform_3, window_bounds = array<i64: 1, 1, 4, 128>}, {transform_indices = @transform_4, window_bounds = array<i64: 1, 1, 4, 128>}]} {
    %c0_i32 = arith.constant 0 : i32
    %0 = arith.cmpi eq, %arg2, %c0_i32 : i32
    %1 = arith.extui %0 : i1 to i32
    %c0_i32_0 = arith.constant 0 : i32
    %2 = arith.cmpi ne, %1, %c0_i32_0 : i32
    scf.if %2 {
      %cst_36 = arith.constant 0.000000e+00 : f32
      %39 = vector.broadcast %cst_36 : f32 to vector<4x128xf32>
      %c0_37 = arith.constant 0 : index
      %c0_38 = arith.constant 0 : index
      %c0_39 = arith.constant 0 : index
      %c0_40 = arith.constant 0 : index
      %40 = vector.load %arg5[%c0_37, %c0_38, %c0_39, %c0_40] : memref<1x1x4x128xf32, #tpu.memory_space<vmem>>, vector<1x1x4x128xf32>
      %41 = vector.shape_cast %40 : vector<1x1x4x128xf32> to vector<4x128xf32>
      %42 = vector.shape_cast %39 : vector<4x128xf32> to vector<1x1x4x128xf32>
      tpu.vector_store %arg5[%c0_37, %c0_38, %c0_39, %c0_40], %42 {strides = array<i32>} : memref<1x1x4x128xf32, #tpu.memory_space<vmem>>, vector<1x1x4x128xf32>,
      %cst_41 = arith.constant 0.000000e+00 : f32
      %43 = vector.broadcast %cst_41 : f32 to vector<4x128xf32>
      %c0_42 = arith.constant 0 : index
      %c0_43 = arith.constant 0 : index
      %c0_44 = arith.constant 0 : index
      %c0_45 = arith.constant 0 : index
      %44 = vector.load %arg6[%c0_42, %c0_43, %c0_44, %c0_45] : memref<1x1x4x128xf32, #tpu.memory_space<vmem>>, vector<1x1x4x128xf32>
      %45 = vector.shape_cast %44 : vector<1x1x4x128xf32> to vector<4x128xf32>
      %46 = vector.shape_cast %43 : vector<4x128xf32> to vector<1x1x4x128xf32>
      tpu.vector_store %arg6[%c0_42, %c0_43, %c0_44, %c0_45], %46 {strides = array<i32>} : memref<1x1x4x128xf32, #tpu.memory_space<vmem>>, vector<1x1x4x128xf32>,
      %cst_46 = arith.constant 0.000000e+00 : f32
      %47 = vector.broadcast %cst_46 : f32 to vector<4x128xf32>
      %c0_47 = arith.constant 0 : index
      %c0_48 = arith.constant 0 : index
      %c0_49 = arith.constant 0 : index
      %c0_50 = arith.constant 0 : index
      %48 = vector.load %arg7[%c0_47, %c0_48, %c0_49, %c0_50] : memref<1x1x4x128xf32, #tpu.memory_space<vmem>>, vector<1x1x4x128xf32>
      %49 = vector.shape_cast %48 : vector<1x1x4x128xf32> to vector<4x128xf32>
      %50 = vector.shape_cast %47 : vector<4x128xf32> to vector<1x1x4x128xf32>
      tpu.vector_store %arg7[%c0_47, %c0_48, %c0_49, %c0_50], %50 {strides = array<i32>} : memref<1x1x4x128xf32, #tpu.memory_space<vmem>>, vector<1x1x4x128xf32>,
    } else {
    }
    %c0 = arith.constant 0 : index
    %c0_1 = arith.constant 0 : index
    %c0_2 = arith.constant 0 : index
    %c0_3 = arith.constant 0 : index
    %3 = vector.load %arg4[%c0, %c0_1, %c0_2, %c0_3] : memref<1x4x2x128xf32, #tpu.memory_space<vmem>>, vector<1x4x2x128xf32>
    %4 = vector.shape_cast %3 : vector<1x4x2x128xf32> to vector<4x2x128xf32>
    %cst = arith.constant dense<0xFF800000> : vector<2x128xf32>
    %5 = vector.multi_reduction <maximumf>, %4, %cst [0] : vector<4x2x128xf32> to vector<2x128xf32>
    %6 = vector.shape_cast %5 : vector<2x128xf32> to vector<1x2x128xf32>
    %7 = vector.broadcast %6 : vector<1x2x128xf32> to vector<4x2x128xf32>
    %8 = arith.subf %4, %7 : vector<4x2x128xf32>
    %9 = math.exp %8 : vector<4x2x128xf32>
    %cst_4 = arith.constant dense<0.000000e+00> : vector<2x128xf32>
    %10 = vector.multi_reduction <add>, %9, %cst_4 [0] : vector<4x2x128xf32> to vector<2x128xf32>
    %11 = vector.shape_cast %10 : vector<2x128xf32> to vector<1x2x128xf32>
    %12 = tpu.reciprocal %11 : vector<1x2x128xf32> -> vector<1x2x128xf32>
    %13 = vector.broadcast %12 : vector<1x2x128xf32> to vector<4x2x128xf32>
    %14 = arith.mulf %9, %13 : vector<4x2x128xf32>
    %c0_5 = arith.constant 0 : index
    %c0_6 = arith.constant 0 : index
    %c0_7 = arith.constant 0 : index
    %c0_8 = arith.constant 0 : index
    %15 = vector.load %arg3[%c0_5, %c0_6, %c0_7, %c0_8] : memref<1x4x2x128xf32, #tpu.memory_space<vmem>>, vector<1x4x2x128xf32>
    %16 = vector.shape_cast %15 : vector<1x4x2x128xf32> to vector<4x2x128xf32>
    %c0_9 = arith.constant 0 : index
    %c0_10 = arith.constant 0 : index
    %c0_11 = arith.constant 0 : index
    %c0_12 = arith.constant 0 : index
    %17 = vector.load %arg5[%c0_9, %c0_10, %c0_11, %c0_12] : memref<1x1x4x128xf32, #tpu.memory_space<vmem>>, vector<1x1x4x128xf32>
    %18 = vector.shape_cast %17 : vector<1x1x4x128xf32> to vector<4x128xf32>
    %cst_13 = arith.constant dense<0.000000e+00> : vector<4x128xf32>
    %19 = vector.multi_reduction <add>, %14, %cst_13 [1] : vector<4x2x128xf32> to vector<4x128xf32>
    %20 = arith.addf %18, %19 : vector<4x128xf32>
    %c0_14 = arith.constant 0 : index
    %c0_15 = arith.constant 0 : index
    %c0_16 = arith.constant 0 : index
    %c0_17 = arith.constant 0 : index
    %21 = vector.load %arg5[%c0_14, %c0_15, %c0_16, %c0_17] : memref<1x1x4x128xf32, #tpu.memory_space<vmem>>, vector<1x1x4x128xf32>
    %22 = vector.shape_cast %21 : vector<1x1x4x128xf32> to vector<4x128xf32>
    %23 = vector.shape_cast %20 : vector<4x128xf32> to vector<1x1x4x128xf32>
    tpu.vector_store %arg5[%c0_14, %c0_15, %c0_16, %c0_17], %23 {strides = array<i32>} : memref<1x1x4x128xf32, #tpu.memory_space<vmem>>, vector<1x1x4x128xf32>,
    %c0_18 = arith.constant 0 : index
    %c0_19 = arith.constant 0 : index
    %c0_20 = arith.constant 0 : index
    %c0_21 = arith.constant 0 : index
    %24 = vector.load %arg6[%c0_18, %c0_19, %c0_20, %c0_21] : memref<1x1x4x128xf32, #tpu.memory_space<vmem>>, vector<1x1x4x128xf32>
    %25 = vector.shape_cast %24 : vector<1x1x4x128xf32> to vector<4x128xf32>
    %cst_22 = arith.constant dense<0.000000e+00> : vector<4x128xf32>
    %26 = vector.multi_reduction <add>, %16, %cst_22 [1] : vector<4x2x128xf32> to vector<4x128xf32>
    %27 = arith.addf %25, %26 : vector<4x128xf32>
    %c0_23 = arith.constant 0 : index
    %c0_24 = arith.constant 0 : index
    %c0_25 = arith.constant 0 : index
    %c0_26 = arith.constant 0 : index
    %28 = vector.load %arg6[%c0_23, %c0_24, %c0_25, %c0_26] : memref<1x1x4x128xf32, #tpu.memory_space<vmem>>, vector<1x1x4x128xf32>
    %29 = vector.shape_cast %28 : vector<1x1x4x128xf32> to vector<4x128xf32>
    %30 = vector.shape_cast %27 : vector<4x128xf32> to vector<1x1x4x128xf32>
    tpu.vector_store %arg6[%c0_23, %c0_24, %c0_25, %c0_26], %30 {strides = array<i32>} : memref<1x1x4x128xf32, #tpu.memory_space<vmem>>, vector<1x1x4x128xf32>,
    %c0_27 = arith.constant 0 : index
    %c0_28 = arith.constant 0 : index
    %c0_29 = arith.constant 0 : index
    %c0_30 = arith.constant 0 : index
    %31 = vector.load %arg7[%c0_27, %c0_28, %c0_29, %c0_30] : memref<1x1x4x128xf32, #tpu.memory_space<vmem>>, vector<1x1x4x128xf32>
    %32 = vector.shape_cast %31 : vector<1x1x4x128xf32> to vector<4x128xf32>
    %33 = arith.mulf %14, %16 : vector<4x2x128xf32>
    %cst_31 = arith.constant dense<0.000000e+00> : vector<4x128xf32>
    %34 = vector.multi_reduction <add>, %33, %cst_31 [1] : vector<4x2x128xf32> to vector<4x128xf32>
    %35 = arith.addf %32, %34 : vector<4x128xf32>
    %c0_32 = arith.constant 0 : index
    %c0_33 = arith.constant 0 : index
    %c0_34 = arith.constant 0 : index
    %c0_35 = arith.constant 0 : index
    %36 = vector.load %arg7[%c0_32, %c0_33, %c0_34, %c0_35] : memref<1x1x4x128xf32, #tpu.memory_space<vmem>>, vector<1x1x4x128xf32>
    %37 = vector.shape_cast %36 : vector<1x1x4x128xf32> to vector<4x128xf32>
    %38 = vector.shape_cast %35 : vector<4x128xf32> to vector<1x1x4x128xf32>
    tpu.vector_store %arg7[%c0_32, %c0_33, %c0_34, %c0_35], %38 {strides = array<i32>} : memref<1x1x4x128xf32, #tpu.memory_space<vmem>>, vector<1x1x4x128xf32>,
    return
  }
  func.func @transform_0(%arg0: i32, %arg1: i32, %arg2: i32) -> (i32, i32, i32, i32) {
    %c1_i32 = arith.constant 1 : i32
    %0 = arith.muli %arg1, %c1_i32 : i32
    %1 = arith.addi %0, %arg2 : i32
    %c0_i32 = arith.constant 0 : i32
    %2 = arith.minsi %1, %c0_i32 : i32
    %c0_i32_0 = arith.constant 0 : i32
    %c0_i32_1 = arith.constant 0 : i32
    %c0_i32_2 = arith.constant 0 : i32
    return %arg0, %c0_i32_0, %2, %c0_i32_1 : i32, i32, i32, i32
  }
  func.func @transform_1(%arg0: i32, %arg1: i32, %arg2: i32) -> (i32, i32, i32, i32) {
    %c1_i32 = arith.constant 1 : i32
    %0 = arith.muli %arg1, %c1_i32 : i32
    %1 = arith.addi %0, %arg2 : i32
    %c0_i32 = arith.constant 0 : i32
    %2 = arith.minsi %1, %c0_i32 : i32
    %c0_i32_0 = arith.constant 0 : i32
    %c0_i32_1 = arith.constant 0 : i32
    %c0_i32_2 = arith.constant 0 : i32
    return %arg0, %c0_i32_0, %2, %c0_i32_1 : i32, i32, i32, i32
  }
  func.func @transform_2(%arg0: i32, %arg1: i32, %arg2: i32) -> (i32, i32, i32, i32) {
    %c0_i32 = arith.constant 0 : i32
    %c0_i32_0 = arith.constant 0 : i32
    %c0_i32_1 = arith.constant 0 : i32
    return %arg0, %arg1, %c0_i32, %c0_i32_0 : i32, i32, i32, i32
  }
  func.func @transform_3(%arg0: i32, %arg1: i32, %arg2: i32) -> (i32, i32, i32, i32) {
    %c0_i32 = arith.constant 0 : i32
    %c0_i32_0 = arith.constant 0 : i32
    %c0_i32_1 = arith.constant 0 : i32
    return %arg0, %arg1, %c0_i32, %c0_i32_0 : i32, i32, i32, i32
  }
  func.func @transform_4(%arg0: i32, %arg1: i32, %arg2: i32) -> (i32, i32, i32, i32) {
    %c0_i32 = arith.constant 0 : i32
    %c0_i32_0 = arith.constant 0 : i32
    %c0_i32_1 = arith.constant 0 : i32
    return %arg0, %arg1, %c0_i32, %c0_i32_0 : i32, i32, i32, i32
  }
}

</mosaic_0001>

<bundles_post_ra>
// kernel: tpu_custom_call.1
= control target key start
LH: loop header
LB: loop body
LE: loop exit
PB: predicated region body
PF: predicated region fallthrough
CT: control target
= control target key end

     0   :  { %s1355_s0 = inlined_call_operand.hbm [shape: f32[2,4,2,128], index: 0, kind: input, shape index: {}]   ;;  %s1356_s1 = inlined_call_operand.hbm [shape: f32[2,4,2,128], index: 1, kind: input, shape index: {}]   ;;  %s1357_s2 = inlined_call_operand.hbm [shape: f32[2,1,4,128], index: 2, kind: output, shape index: {0}]   ;;  %s1358_s3 = inlined_call_operand.hbm [shape: f32[2,1,4,128], index: 3, kind: output, shape index: {1}]   ;;  %s1359_s4 = inlined_call_operand.hbm [shape: f32[2,1,4,128], index: 4, kind: output, shape index: {2}]  }
   0x1   :  { %1363 = sst [smem:[#allocation17_spill]] %s1355_s0 }
   0x2   :  { %10 = vsyncpa [#allocation3], 0 }
   0x3   :  { %12 = vsyncpa [#allocation3 + $0x1], 0 }
   0x4   :  { %13 = vsyncpa [#allocation6], 0 }
   0x5   :  { %15 = vsyncpa [#allocation6 + $0x1], 0 }
   0x6   :  { %16 = vsyncpa [#allocation4], 0 }
   0x7   :  { %18 = vsyncpa [#allocation4 + $0x1], 0 }
   0x8   :  { %19 = vsyncpa [#allocation9], 0 }
   0x9   :  { %21 = vsyncpa [#allocation9 + $0x1], 0  ;;  %s1100_s15 = smov 0   ;;  %s1102_s16 = smov 0  }
   0xa   :  { %s1104_s17 = smov 0   ;;  %s1106_s18 = smov 0  }
   0xb   :  { %s1108_s19 = smov 0   ;;  %s1110_s20 = smov 0  }
   0xc LB: > { %1364 = sst [smem:[#allocation15_spill]] %s1066_s19  ;;  %s1131_s21 = sadd.s32 4294967295, %s1070_s20   ;;  %s1070_s20 = sphi %s1110_s20, %s27_s20   ;;  %s1066_s19 = sphi %s1108_s19, %s1374_s19   ;;  %s1062_s18 = sphi %s1106_s18, %s1373_s18   ;;  %s1058_s17 = sphi %s1104_s17, %s1377_s17   ;;  %s1054_s16 = sphi %s1102_s16, %s1376_s16   ;;  %s1050_s15 = sphi %s1100_s15, %s1375_s15  }
   0xd   : > { %s1360_s22 = sadd.s32 4294967294, %s1070_s20   ;;  %s46_s23 = sadd.s32 1, %s1066_s19 }
   0xe   : > { %s61_s24 = sadd.s32 1, %s1058_s17  ;;  %p48_p0 = scmp.ge.s32.totalorder %s46_s23, 2 }
   0xf   : > { %p68_p1 = scmp.ne.s32.totalorder %s1058_s17, %s1054_s16  ;;  %p69_p2 = scmp.eq.s32.totalorder %s1070_s20, 0 }
  0x10   : > { %p74_p3 = scmp.ne.s32.totalorder %s1054_s16, %s1050_s15  ;;  %s1379_s23 = smov (%p48_p0, %s46_s23), 0 }
  0x11   : > { %1365 = sst [smem:[#allocation16_spill]] %s1379_s23  ;;  %p1143_p4 = por %p69_p2, %p68_p1 }
  0x12   : > { %p75_p5 = scmp.eq.s32.totalorder %s1131_s21, 0  ;;  %s56_s26 = ssub.s32 %s1066_s19, %s1379_s23 }
  0x13   : > { %p134_p6 = scmp.eq.s32.totalorder %s1131_s21, 1  ;;  %p59_p7 = scmp.eq.s32.totalorder %s56_s26, 0 }
  0x14   : > { %p1151_p8 = por %p75_p5, %p74_p3  ;;  %p140_p10 = scmp.eq.s32.totalorder %s1360_s22, 1 }
  0x15   : > { %p1155_p9 = por %p134_p6, %p68_p1  ;;  %p751_p12 = scmp.ge.s32.totalorder %s1070_s20, 2 }
  0x16   : > { %s1162_s29 = scalar_select %p59_p7, %s1058_s17, %s61_s24  }
  0x17   : > { %p1164_p11 = por %p140_p10, %p74_p3  ;;  %p801_p13 = scmp.lt.s32.totalorder %s1070_s20, 2 }
  0x18   : > { %s1171_s5 = sand.u32 1, %s1058_s17   ;;  %s772_s7 = sshll.u32 %s1066_s19, 3 }
  0x19   : > { %s752_s6 = sshll.u32 %s1171_s5, 3  ;;  %s1370_s0 = sld [smem:[#allocation17_spill]] }
  0x1a   : > { %s220_s11 = scalar_lea.vmem [#allocation2], %s752_s6  ;;  %p1180_p0 = pnand %p801_p13, %p1143_p4 }
  0x1b   : > { %s232_s12 = sshll.u32 %s220_s11, 4  ;;  %p758_p1 = scmp.ge.s32.totalorder %s1070_s20, 1  ;;  %s233_s12 = int_to_ptr.vmem [resolvable:$true] %s232_s12 }
  0x1c   : > { %s217_s24 = scalar_lea.sflag [#allocation3], %s1171_s5  ;;  %s1072_s26 = smov 32  }
  0x1d   : > { %s1073_s22 = smov 2   ;;  %p266_p2 = scmp.lt.s32.totalorder %s1070_s20, 3 }
  0x1e   : > { %s246_s25 = scalar_lea.vmem [#allocation5], %s752_s6  ;;  %s243_s23 = scalar_lea.sflag [#allocation6], %s1171_s5 }
  0x1f   : > { %s229_s10 = scalar_lea.hbm %s1370_s0, %s772_s7  ;;  %p267_p3 = pnand %p758_p1, %p266_p2 }
  0x20   : > { %s230_s13 = sshll.u32 %s229_s10, 4  ;;  %s255_s10 = scalar_lea.hbm %s1356_s1, %s772_s7  ;;  %s231_s13 = int_to_ptr.hbm [resolvable:$true] %s230_s13 }
  0x21   : > { %787 = dma.hbm_to_vmem [thread:$0]  (!%p1180_p0), %s231_s13, 128, %s233_s12, %s217_s24, %s1072_s26, %s1072_s26, %s1073_s22  }
  0x22   : > { %s256_s11 = sshll.u32 %s255_s10, 4  ;;  %s258_s0 = sshll.u32 %s246_s25, 4  ;;  %s257_s11 = int_to_ptr.hbm [resolvable:$true] %s256_s11  ;;  %s259_s0 = int_to_ptr.vmem [resolvable:$true] %s258_s0 }
  0x23   : > { %790 = dma.hbm_to_vmem [thread:$0]  (!%p1180_p0), %s257_s11, 128, %s259_s0, %s243_s23, %s1072_s26, %s1072_s26, %s1073_s22  }
  0x24   : > { %270 = sbr.rel (%p267_p3) target bundleno = 128 (0x80), region = 28  ;;  %s1196_s19 = sand.u32 (!%p267_p3), 1, %s1054_s16  }
  0x25   : > { %s759_s12 = sshll.u32 (!%p267_p3), %s1196_s19, 3  ;;  %s273_s13 = scalar_lea.sflag (!%p267_p3), [#allocation3], %s1196_s19 }
  0x26   : > { %s276_s24 = scalar_lea.vmem (!%p267_p3), [#allocation2], %s759_s12 }
  0x29   : > { %1033 = dma.done.wait (%p1151_p8), %s273_s13, 128  }
  0x2a   : > { %1035 = vsyncadd (%p1151_p8), %s273_s13, 4294967168  ;;  %s283_s5 = scalar_lea.sflag [#allocation6], %s1196_s19  ;;  %s286_s6 = scalar_lea.vmem [#allocation5], %s759_s12 }
  0x2b   : > { %1037 = dma.done.wait (%p1151_p8), %s283_s5, 128  }
  0x2c   : > { %1039 = vsyncadd (%p1151_p8), %s283_s5, 4294967168  ;;  %s761_s0 = sshll.u32 %s1196_s19, 2  ;;  %v1074_v0 = vmov 0.0   ;;  %vm344_vm0 = vcmask 1041408   ;;  %v1219_v1 = vld [vmem:[%s276_s24] sm:$0x3] }
  0x2d   : > { %s1210_s22 = scalar_lea.vmem [#allocation8], %s761_s0  ;;  %s1213_s23 = scalar_lea.vmem [#allocation7], %s761_s0  ;;  %v1221_v2 = vld [vmem:[%s276_s24 + $0x2] sm:$0x3]  ;;  %v1223_v3 = vld [vmem:[%s276_s24 + $0x4] sm:$0x3] }
  0x2e   : > { %338 = vst [vmem:[%s1210_s22] sm:$0xf] %v1074_v0  ;;  %s1216_s7 = scalar_lea.vmem [#allocation10], %s761_s0  ;;  %v1225_v4 = vld [vmem:[%s276_s24 + $0x6] sm:$0x3]  ;;  %v436_v5 = vsel %vm344_vm0, %v1219_v1, 0.0  ;;  %v443_v6 = vsel %vm344_vm0, %v1221_v2, 0.0 }
  0x2f   : > { %337 = vst [vmem:[%s1213_s23] sm:$0xf] %v1074_v0  ;;  %v450_v7 = vsel %vm344_vm0, %v1223_v3, 0.0  ;;  %v437_v8 = vrot.slane %v436_v5, 4  ;;  %v444_v9 = vrot.slane %v443_v6, 4  ;;  %v457_v11 = vsel %vm344_vm0, %v1225_v4, 0.0  ;;  %s1240_s27 = sshll.u32 %s1062_s18, 2 }
  0x30   : > { %339 = vst [vmem:[%s1216_s7] sm:$0xf] %v1074_v0  ;;  %v451_v10 = vrot.slane %v450_v7, 4  ;;  %v458_v12 = vrot.slane %v457_v11, 4  ;;  %v340_v13 = vld [vmem:[%s286_s6] sm:$0x3]  ;;  %vm426_vm1 = vcmask 1041409   ;;  %s554_s18 = scalar_lea.hbm %s1358_s3, %s1240_s27 }
  0x31   : > { %v341_v14 = vld [vmem:[%s286_s6 + $0x2] sm:$0x3]  ;;  %v438_v15 = vadd.f32 %v437_v8, %v436_v5  ;;  %v445_v16 = vadd.f32 %v444_v9, %v443_v6  ;;  %v342_v18 = vld [vmem:[%s286_s6 + $0x4] sm:$0x3]  ;;  %v343_v19 = vld [vmem:[%s286_s6 + $0x6] sm:$0x3] }
  0x32   : > { %v452_v17 = vadd.f32 %v451_v10, %v450_v7  ;;  %v345_v20 = vsel %vm344_vm0, %v340_v13, -inf  ;;  %v459_v21 = vadd.f32 %v458_v12, %v457_v11  ;;  %v346_v22 = vsel %vm344_vm0, %v341_v14, -inf  ;;  %s522_s8 = sand.u32 1, %s1131_s21   ;;  %s556_s9 = sshll.u32 %s1210_s22, 4  ;;  %s557_s9 = int_to_ptr.vmem [resolvable:$true] %s556_s9 }
  0x33   : > { %v347_v23 = vsel %vm344_vm0, %v342_v18, -inf  ;;  %v348_v24 = vsel %vm344_vm0, %v343_v19, -inf  ;;  %v439_v25 = vrot.slane %v438_v15, 2  ;;  %v446_v26 = vrot.slane %v445_v16, 2  ;;  %s558_s10 = sshll.u32 %s554_s18, 4  ;;  %s1253_s21 = scalar_lea.sflag [#allocation9], %s522_s8  ;;  %s559_s10 = int_to_ptr.hbm [resolvable:$true] %s558_s10 }
  0x34   : > { %v453_v27 = vrot.slane %v452_v17, 2  ;;  %v349_v28 = vmax.f32 %v345_v20, %v346_v22  ;;  %v460_v29 = vrot.slane %v459_v21, 2  ;;  %v350_v30 = vmax.f32 %v347_v23, %v348_v24  ;;  %s938_s11 = sshra.s32 %s559_s10, 4  ;;  %s944_s24 = scalar_lea.hbm %s1358_s3, 8  ;;  %s939_s11 = int_to_ptr.hbm [resolvable:$true] %s938_s11 }
  0x35   : > { %v440_v31 = vadd.f32 %v439_v25, %v438_v15  ;;  %v447_v32 = vadd.f32 %v446_v26, %v445_v16  ;;  %vm428_vm2 = vcmask 1042434   ;;  %vm430_vm3 = vcmask 1043459   ;;  %v435_v51 = vld [vmem:[%s1210_s22] sm:$0xf]  ;;  %s940_s25 = scalar_lea.hbm %s939_s11, 4  ;;  %p945_p7 = scmp.lt.s32.totalorder %s939_s11, %s1358_s3 }
  0x36   : > { %v454_v33 = vadd.f32 %v453_v27, %v452_v17  ;;  %v461_v34 = vadd.f32 %v460_v29, %v459_v21  ;;  %v351_v35 = vmax.f32 %v349_v28, %v350_v30  ;;  %p941_p4 = scmp.ne.s32.totalorder %s939_s11, %s940_s25  ;;  %p946_p8 = scmp.lt.s32.totalorder %s944_s24, %s940_s25 }
  0x37   : > { %v441_v36 = vrot.slane %v440_v31, 1  ;;  %v448_v37 = vrot.slane %v447_v32, 1 }
  0x38   : > { %v455_v38 = vrot.slane %v454_v33, 1  ;;  %v462_v39 = vrot.slane %v461_v34, 1  ;;  %v352_v40 = vsub.f32 %v340_v13, %v351_v35  ;;  %v353_v41 = vsub.f32 %v341_v14, %v351_v35  ;;  %p942_p5 = pnand %p941_p4, %p1155_p9  ;;  %p947_p10 = por %p946_p8, %p945_p7 }
  0x39   : > { %v354_v42 = vsub.f32 %v342_v18, %v351_v35  ;;  %v442_v43 = vadd.f32 %v441_v36, %v440_v31  ;;  %v449_v44 = vadd.f32 %v448_v37, %v447_v32  ;;  %v355_v46 = vsub.f32 %v343_v19, %v351_v35 }
  0x3a   : > { %v456_v45 = vadd.f32 %v455_v38, %v454_v33  ;;  %v463_v47 = vadd.f32 %v462_v39, %v461_v34  ;;  %v356_v48 = vmul.f32 1.442695, %v352_v40  ;;  %v358_v49 = vmul.f32 1.442695, %v353_v41  ;;  %p943_p6 = pneg %p942_p5 }
  0x3b   : > { %v360_v50 = vmul.f32 1.442695, %v354_v42  ;;  %v468_v52 = vsel %vm426_vm1, %v449_v44, %v442_v43  ;;  %v362_v53 = vmul.f32 1.442695, %v355_v46 }
  0x3c   : > { %v469_v54 = vsel %vm428_vm2, %v456_v45, %v468_v52  ;;  %854 = vpow2.f32 %v356_v48  ;;  %p948_p13 = pnand %p947_p10, %p943_p6 }
  0x3d   : > { %v470_v55 = vsel %vm430_vm3, %v463_v47, %v469_v54  ;;  %856 = vpow2.f32 %v358_v49 }
  0x3e   : > { %v472_v56 = vadd.f32 %v470_v55, %v435_v51  ;;  %858 = vpow2.f32 %v360_v50 }
  0x3f   : > { %860 = vpow2.f32 %v362_v53 }
  0x40   : > { %473 = vst [vmem:[%s1210_s22] sm:$0xf] %v472_v56 }
  0x41   : > { %951 = shalt.err (!%p948_p13)
}
  0x42   : > { %779 = dma.vmem_to_hbm [thread:$0]  (%p1155_p9), %s557_s9, 64, %s559_s10, %s1253_s21   ;;  %v855_v57 = vpop.eup %854 }
  0x43   : > { %v857_v58 = vpop.eup %856  ;;  %v364_v59 = vsel %vm344_vm0, %v855_v57, 0.0  ;;  %s539_s14 = scalar_lea.hbm %s1357_s2, %s1240_s27  ;;  %s541_s26 = sshll.u32 %s1213_s23, 4  ;;  %s542_s26 = int_to_ptr.vmem [resolvable:$true] %s541_s26 }
  0x44   : > { %v859_v60 = vpop.eup %858  ;;  %v365_v61 = vsel %vm344_vm0, %v857_v58, 0.0  ;;  %s1289_s18 = sshll.u32 %s539_s14, 4  ;;  %s569_s10 = scalar_lea.hbm %s1359_s4, %s1240_s27  ;;  %s544_s18 = int_to_ptr.hbm [resolvable:$true] %s1289_s18 }
  0x45   : > { %v861_v62 = vpop.eup %860  ;;  %v366_v63 = vadd.f32 %v365_v61, %v364_v59  ;;  %v367_v0 = vsel %vm344_vm0, %v859_v60, 0.0  ;;  %s571_s11 = sshll.u32 %s1216_s7, 4  ;;  %s1302_s25 = sshll.u32 %s569_s10, 4  ;;  %s572_s11 = int_to_ptr.vmem [resolvable:$true] %s571_s11  ;;  %s574_s25 = int_to_ptr.hbm [resolvable:$true] %s1302_s25 }
  0x46   : > { %v369_v5 = vsel %vm344_vm0, %v861_v62, 0.0  ;;  %s518_s12 = scalar_lea.sflag [#allocation4], %s1196_s19  ;;  %s966_s13 = sshra.s32 %s544_s18, 4  ;;  %s967_s13 = int_to_ptr.hbm [resolvable:$true] %s966_s13 }
  0x47   : > { %v368_v6 = vadd.f32 %v367_v0, %v366_v63  ;;  %s968_s27 = scalar_lea.hbm %s967_s13, 4  ;;  %s972_s6 = scalar_lea.hbm %s1357_s2, 8 }
  0x48   : > { %p969_p0 = scmp.ne.s32.totalorder %s967_s13, %s968_s27  ;;  %p973_p3 = scmp.lt.s32.totalorder %s967_s13, %s1357_s2 }
  0x49   : > { %v370_v7 = vadd.f32 %v369_v5, %v368_v6  ;;  %p974_p4 = scmp.lt.s32.totalorder %s972_s6, %s968_s27 }
  0x4a   : > { %p970_p1 = pnand %p969_p0, %p1155_p9 }
  0x4b   : > { %862 = vrcp.f32 %v370_v7  ;;  %v382_v10 = vand.u32 2147483648, %v370_v7  ;;  %vm376_vm4 = vweird.f32 %v370_v7  ;;  %v380_v12 = vand.u32 2147483647, %v370_v7  ;;  %p975_p5 = por %p974_p4, %p973_p3 }
  0x4c   : > { %p971_p2 = pneg %p970_p1 }
  0x4d   : > { %v383_v14 = vor.u32 1.1754944e-38, %v382_v10  ;;  %vm381_vm7 = vcmp.eq.f32.partialorder %v380_v12, 8.507059e+37  ;;  %v393_v10 = vld [vmem:[%s1213_s23] sm:$0xf] }
  0x4e   : > { %p976_p6 = pnand %p975_p5, %p971_p2 }
  0x51   : > { %v863_v8 = vpop.eup %862 }
  0x52   : > { %v372_v9 = vmul.f32 %v863_v8, %v370_v7  ;;  %vm377_vm5 = vweird.f32 %v863_v8 }
  0x53   : > { %vm378_vm6 = vmor %vm376_vm4, %vm377_vm5 }
  0x54   : > { %v373_v11 = vsub.f32 1.0, %v372_v9 }
  0x56   : > { %v374_v13 = vmul.f32 %v863_v8, %v373_v11 }
  0x58   : > { %v375_v15 = vadd.f32 %v863_v8, %v374_v13 }
  0x5a   : > { %v379_v16 = vsel %vm378_vm6, %v863_v8, %v375_v15 }
  0x5b   : > { %v384_v17 = vsel %vm381_vm7, %v383_v14, %v379_v16 }
  0x5c   : > { %v385_v18 = vmul.f32 %v855_v57, %v384_v17  ;;  %v386_v19 = vmul.f32 %v857_v58, %v384_v17  ;;  %v387_v20 = vmul.f32 %v859_v60, %v384_v17  ;;  %v388_v21 = vmul.f32 %v861_v62, %v384_v17 }
  0x5e   : > { %v394_v22 = vsel %vm344_vm0, %v385_v18, 0.0  ;;  %v401_v23 = vsel %vm344_vm0, %v386_v19, 0.0  ;;  %v408_v24 = vsel %vm344_vm0, %v387_v20, 0.0  ;;  %v415_v25 = vsel %vm344_vm0, %v388_v21, 0.0 }
  0x5f   : > { %v395_v26 = vrot.slane %v394_v22, 4  ;;  %v402_v27 = vrot.slane %v401_v23, 4  ;;  %v409_v28 = vrot.slane %v408_v24, 4  ;;  %v416_v29 = vrot.slane %v415_v25, 4 }
  0x60   : > { %v475_v30 = vmul.f32 %v1219_v1, %v385_v18  ;;  %v476_v31 = vmul.f32 %v1221_v2, %v386_v19  ;;  %v477_v32 = vmul.f32 %v1223_v3, %v387_v20  ;;  %v478_v33 = vmul.f32 %v1225_v4, %v388_v21 }
  0x61   : > { %v396_v34 = vadd.f32 %v395_v26, %v394_v22  ;;  %v403_v35 = vadd.f32 %v402_v27, %v401_v23  ;;  %v410_v36 = vadd.f32 %v409_v28, %v408_v24  ;;  %v417_v37 = vadd.f32 %v416_v29, %v415_v25  ;;  %v474_v23 = vld [vmem:[%s1216_s7] sm:$0xf] }
  0x62   : > { %v479_v38 = vsel %vm344_vm0, %v475_v30, 0.0  ;;  %v486_v39 = vsel %vm344_vm0, %v476_v31, 0.0  ;;  %v493_v40 = vsel %vm344_vm0, %v477_v32, 0.0  ;;  %v500_v41 = vsel %vm344_vm0, %v478_v33, 0.0 }
  0x63   : > { %v397_v42 = vrot.slane %v396_v34, 2  ;;  %v404_v1 = vrot.slane %v403_v35, 2  ;;  %v411_v43 = vrot.slane %v410_v36, 2  ;;  %v418_v2 = vrot.slane %v417_v37, 2 }
  0x64   : > { %v480_v44 = vrot.slane %v479_v38, 4  ;;  %v487_v3 = vrot.slane %v486_v39, 4  ;;  %v494_v45 = vrot.slane %v493_v40, 4  ;;  %v501_v4 = vrot.slane %v500_v41, 4 }
  0x65   : > { %v398_v46 = vadd.f32 %v397_v42, %v396_v34  ;;  %v405_v47 = vadd.f32 %v404_v1, %v403_v35  ;;  %v412_v48 = vadd.f32 %v411_v43, %v410_v36  ;;  %v419_v49 = vadd.f32 %v418_v2, %v417_v37 }
  0x66   : > { %v481_v50 = vadd.f32 %v480_v44, %v479_v38  ;;  %v488_v51 = vadd.f32 %v487_v3, %v486_v39  ;;  %v495_v52 = vadd.f32 %v494_v45, %v493_v40  ;;  %v502_v53 = vadd.f32 %v501_v4, %v500_v41 }
  0x67   : > { %v399_v54 = vrot.slane %v398_v46, 1  ;;  %v406_v55 = vrot.slane %v405_v47, 1  ;;  %v413_v56 = vrot.slane %v412_v48, 1  ;;  %v420_v57 = vrot.slane %v419_v49, 1 }
  0x68   : > { %v482_v58 = vrot.slane %v481_v50, 2  ;;  %v489_v59 = vrot.slane %v488_v51, 2  ;;  %v496_v60 = vrot.slane %v495_v52, 2  ;;  %v503_v61 = vrot.slane %v502_v53, 2 }
  0x69   : > { %v400_v62 = vadd.f32 %v399_v54, %v398_v46  ;;  %v407_v63 = vadd.f32 %v406_v55, %v405_v47  ;;  %v414_v0 = vadd.f32 %v413_v56, %v412_v48  ;;  %v421_v5 = vadd.f32 %v420_v57, %v419_v49 }
  0x6a   : > { %v483_v6 = vadd.f32 %v482_v58, %v481_v50  ;;  %v490_v7 = vadd.f32 %v489_v59, %v488_v51  ;;  %v497_v8 = vadd.f32 %v496_v60, %v495_v52  ;;  %v504_v9 = vadd.f32 %v503_v61, %v502_v53 }
  0x6b   : > { %v427_v11 = vsel %vm426_vm1, %v407_v63, %v400_v62 }
  0x6c   : > { %v429_v12 = vsel %vm428_vm2, %v414_v0, %v427_v11  ;;  %v484_v13 = vrot.slane %v483_v6, 1  ;;  %v491_v14 = vrot.slane %v490_v7, 1  ;;  %v498_v15 = vrot.slane %v497_v8, 1 }
  0x6d   : > { %v431_v16 = vsel %vm430_vm3, %v421_v5, %v429_v12  ;;  %v505_v17 = vrot.slane %v504_v9, 1 }
  0x6e   : > { %v433_v18 = vadd.f32 %v431_v16, %v393_v10  ;;  %v485_v19 = vadd.f32 %v484_v13, %v483_v6  ;;  %v492_v20 = vadd.f32 %v491_v14, %v490_v7  ;;  %v499_v21 = vadd.f32 %v498_v15, %v497_v8 }
  0x6f   : > { %v506_v22 = vadd.f32 %v505_v17, %v504_v9 }
  0x70   : > { %434 = vst [vmem:[%s1213_s23] sm:$0xf] %v433_v18  ;;  %v511_v24 = vsel %vm426_vm1, %v492_v20, %v485_v19 }
  0x71   : > { %v512_v25 = vsel %vm428_vm2, %v499_v21, %v511_v24 }
  0x72   : > { %979 = shalt.err (!%p976_p6)
}
  0x73   : > { %778 = dma.vmem_to_hbm [thread:$0]  (%p1155_p9), %s542_s26, 64, %s544_s18, %s518_s12   ;;  %v513_v26 = vsel %vm430_vm3, %v506_v22, %v512_v25 }
  0x74   : > { %v515_v27 = vadd.f32 %v513_v26, %v474_v23  ;;  %s994_s19 = sshra.s32 %s574_s25, 4  ;;  %s1000_s9 = scalar_lea.hbm %s1359_s4, 8  ;;  %s995_s19 = int_to_ptr.hbm [resolvable:$true] %s994_s19 }
  0x75   : > { %s996_s22 = scalar_lea.hbm %s995_s19, 4  ;;  %p1001_p13 = scmp.lt.s32.totalorder %s995_s19, %s1359_s4 }
  0x76   : > { %516 = vst [vmem:[%s1216_s7] sm:$0xf] %v515_v27  ;;  %p997_p7 = scmp.ne.s32.totalorder %s995_s19, %s996_s22  ;;  %p1002_p0 = scmp.lt.s32.totalorder %s1000_s9, %s996_s22 }
  0x78   : > { %p998_p8 = pnand %p997_p7, %p1155_p9  ;;  %p1003_p1 = por %p1002_p0, %p1001_p13 }
  0x7a   : > { %p999_p10 = pneg %p998_p8 }
  0x7c   : > { %p1004_p2 = pnand %p1003_p1, %p999_p10 }
  0x7e   : > { %1007 = shalt.err (!%p1004_p2)
}
  0x7f   : > { %780 = dma.vmem_to_hbm [thread:$0]  (%p1155_p9), %s572_s11, 64, %s574_s25, %s1253_s21  }
  0x80 PF: > { %s585_s7 = sand.u32 1, %s1050_s15   ;;  %p792_p3 = pnand %p751_p12, %p1164_p11 }
  0x81   : > { %s586_s26 = scalar_lea.sflag [#allocation4], %s585_s7 }
  0x82   : > { %p793_p4 = pneg %p792_p3 }
  0x84   : > { %1041 = dma.done.wait (%p793_p4), %s586_s26, 64  }
  0x85   : > { %1043 = vsyncadd (%p793_p4), %s586_s26, 4294967232  ;;  %s1372_s18 = sadd.s32 4294967294, %s1070_s20  }
  0x86   : > { %s595_s12 = sand.u32 1, %s1372_s18  }
  0x87   : > { %s596_s27 = scalar_lea.sflag [#allocation9], %s595_s12 }
  0x88   : > { %1045 = dma.done.wait (%p793_p4), %s596_s27, 128  }
  0x89   : > { %1047 = vsyncadd (%p793_p4), %s596_s27, 4294967168  ;;  %s27_s20 = sadd.s32 1, %s1070_s20   ;;  %s1373_s18 = sld [smem:[#allocation15_spill]] }
  0x8a   : > { %p24_p9 = scmp.ge.s32.totalorder %s27_s20, 4   ;;  %s1374_s19 = sld [smem:[#allocation16_spill]] }
  0x8b   : > { %s1375_s15 = smov %s1054_s16  ;;  %s1376_s16 = smov %s1058_s17 }
  0x8c   : > { %s1377_s17 = smov %s1162_s29  ;;  %26 = sbr.rel (!%p24_p9) target bundleno = 12 (0xc), region = 122 }
  0x91   :  { %612 = vsyncpa [#allocation3], 1 }
  0x92   :  { %614 = vsyncpa [#allocation3 + $0x1], 1 }
  0x93   :  { %615 = vsyncpa [#allocation6], 1 }
  0x94   :  { %617 = vsyncpa [#allocation6 + $0x1], 1 }
  0x95   :  { %618 = vsyncpa [#allocation4], 1 }
  0x96   :  { %620 = vsyncpa [#allocation4 + $0x1], 1 }
  0x97   :  { %621 = vsyncpa [#allocation9], 1 }
  0x98   :  { %623 = vsyncpa [#allocation9 + $0x1], 1 }

</bundles_post_ra>
